<compile_context>
chip_gen: v7x
topology: tpu7x:2x2x1
jax: 0.10.0
libtpu: 0.0.40
codegen_flags: <defaults>
</compile_context>

<pallas_src>
import functools

import jax
import jax.numpy as jnp
from jax.experimental import pallas as pl
from jax.experimental.pallas import tpu as pltpu


def _rmsnorm_kernel(x_ref, w_ref, o_ref, *, eps: float):
    # x_ref: (TILE_R, C) block of the (possibly low-precision) input.
    # w_ref: (1, C) f32 weight, resident across the whole grid.
    x = x_ref[...]
    # Sum-of-squares computed from a strip-wise consumed f32 upcast; the cast
    # is recomputed at the store step so a full f32 copy of the tile need not
    # stay live (smaller live set -> larger row tiles; extra casts are free
    # because the kernel is HBM-bound).
    mean_sq = jnp.mean(jnp.square(x.astype(jnp.float32)), axis=-1, keepdims=True)
    inv = jax.lax.rsqrt(mean_sq + eps)                                  # (TILE_R, 1)
    o_ref[...] = (x.astype(jnp.float32) * inv * w_ref[...]).astype(o_ref.dtype)


def _round_up(x: int, m: int) -> int:
    return -(-x // m) * m


def _tpu_vmem_and_cores():
    """Per-TensorCore VMEM capacity and TC count (heuristic, safe fallback)."""
    vmem = None
    try:
        info = pltpu.get_tpu_info()
        vmem = getattr(info, "vmem_capacity_bytes", None)
    except Exception:
        vmem = None
    if not vmem:
        vmem = 64 << 20  # conservative fallback: v7x per-TC VMEM
    # v7x: 64 MiB VMEM per TC, 2 TCs/chip.  v5e/v6e: 128 MiB, 1 TC.
    num_tc = 2 if vmem <= (96 << 20) else 1
    return int(vmem), int(num_tc)


def _choose_tile_rows(n_rows: int, C: int, itemsize: int,
                      vmem_capacity: int, num_tc: int) -> int:
    """Sublane-aligned row tile whose pipelined working set stays inside VMEM."""
    # Sublane packing: 8 rows for 4-byte dtypes, 16 for 2-byte, 32 for 1-byte.
    packing = max(8, 32 // max(itemsize, 1))
    # Generation-aware block budget: ~3/8 of physical per-core VMEM.
    budget = (vmem_capacity * 3) // 8
    # Per-row bytes: double-buffered src-dtype input + output (2 + 2 copies)
    # plus ~1.5x f32-sized transient temporaries inside the kernel.
    bytes_per_row = C * (4 * itemsize + 6)
    tile = budget // max(bytes_per_row, 1)
    # No fixed row cap: only clamp to the (rounded-up) total row count.
    tile = min(tile, _round_up(n_rows, packing))
    if num_tc > 1:
        # Guarantee >= num_tc grid steps so megacore sharding feeds every TC.
        tile = min(tile, _round_up(-(-n_rows // num_tc), packing))
    tile = max(packing, (tile // packing) * packing)
    if num_tc == 2:
        # Prefer an even grid so the 2-way core split is balanced.
        grid = -(-n_rows // tile)
        if grid > 1 and grid % 2 == 1:
            alt = max(packing, _round_up(-(-n_rows // (grid + 1)), packing))
            if (-(-n_rows // alt)) % 2 == 0:
                tile = alt
    return int(tile)


def fast_rms_norm(x: jax.Array, weight: jax.Array, eps: float = 1e-6,
                  tile_rows: int | None = None) -> jax.Array:
    """RMSNorm over the last axis, computed in f32, output in x.dtype."""
    orig_shape = x.shape
    C = orig_shape[-1]
    assert weight.shape == (C,)

    # Flatten all leading dims into rows.
    x2d = x.reshape(-1, C)
    R = x2d.shape[0]
    itemsize = jnp.dtype(x.dtype).itemsize

    vmem_capacity, num_tc = _tpu_vmem_and_cores()
    if tile_rows is None:
        tile_rows = _choose_tile_rows(R, C, itemsize, vmem_capacity, num_tc)

    # Pre-cast weight to f32 once outside the kernel; it stays resident.
    w2d = weight.reshape(1, C).astype(jnp.float32)

    # VMEM limit derived from the actual chosen block:
    #   2x double-buffered input + 2x output (src dtype) + ~1.5x f32 temps
    #   + resident weight + slack for compiler internal scratch,
    # clamped under physical per-core VMEM.  This also protects callers who
    # pass tile_rows manually with large C from silently overcommitting.
    blk_elems = tile_rows * C
    vmem_limit = (4 * blk_elems * itemsize           # 2x in + 2x out buffers
                  + (3 * blk_elems * 4) // 2         # ~1.5x f32 temporaries
                  + 2 * C * 4                        # resident weight (+buffer)
                  + (6 << 20))                       # slack
    vmem_limit = max(vmem_limit, 32 << 20)
    vmem_limit = min(vmem_limit, vmem_capacity - (4 << 20))
    vmem_limit = int(vmem_limit)

    # Advisory cost: one read + one write of x (src dtype) + the weight,
    # ~5 flops/element, one rsqrt per row.
    cost = pl.CostEstimate(
        flops=5 * R * C,
        transcendentals=R,
        bytes_accessed=2 * R * C * itemsize + C * 4,
    )

    grid = (pl.cdiv(R, tile_rows),)  # ragged last block handled by Pallas masking
    out = pl.pallas_call(
        functools.partial(_rmsnorm_kernel, eps=eps),
        out_shape=jax.ShapeDtypeStruct((R, C), x.dtype),
        grid_spec=pltpu.PrefetchScalarGridSpec(
            num_scalar_prefetch=0,
            grid=grid,
            in_specs=[
                pl.BlockSpec((tile_rows, C), lambda i: (i, 0)),  # x rows
                pl.BlockSpec((1, C), lambda i: (0, 0)),          # weight (resident)
            ],
            out_specs=pl.BlockSpec((tile_rows, C), lambda i: (i, 0)),
        ),
        compiler_params=pltpu.CompilerParams(
            dimension_semantics=("parallel",),
            vmem_limit_bytes=vmem_limit,
        ),
        cost_estimate=cost,
    )(x2d, w2d)

    return out.reshape(orig_shape)


def _reference(x, weight, eps):
    xf = x.astype(jnp.float32)
    ms = jnp.mean(xf * xf, axis=-1, keepdims=True)
    y = xf * jax.lax.rsqrt(ms + eps) * weight.astype(jnp.float32)
    return y.astype(x.dtype)


if __name__ == "__main__":
    key = jax.random.PRNGKey(0)
    eps = 1e-6

    # Case 1: bf16 input (exercises .float() compute + cast back to src dtype),
    # C a multiple of 128 so stores are lane-dense.
    B, L, C = 2, 16, 256
    weight = jnp.ones((C,), dtype=jnp.float32)   # nn.Parameter(torch.ones(C))
    x = jax.random.normal(key, (B, L, C), dtype=jnp.float32).astype(jnp.bfloat16)
    y = jax.block_until_ready(fast_rms_norm(x, weight, eps=eps))
    y_ref = _reference(x, weight, eps)
    assert y.shape == x.shape and y.dtype == x.dtype
    assert jnp.allclose(y.astype(jnp.float32), y_ref.astype(jnp.float32),
                        atol=1e-2, rtol=1e-2)

    # Case 2: f32 input with a row count that is not tile-aligned (ragged
    # last block masked by Pallas).
    B2, L2, C2 = 3, 5, 128
    w2 = jnp.ones((C2,), dtype=jnp.float32)
    x2 = jax.random.normal(jax.random.PRNGKey(1), (B2, L2, C2), dtype=jnp.float32)
    y2 = jax.block_until_ready(fast_rms_norm(x2, w2, eps=eps))
    y2_ref = _reference(x2, w2, eps)
    assert y2.shape == x2.shape and y2.dtype == x2.dtype
    assert jnp.allclose(y2, y2_ref, atol=1e-5, rtol=1e-5)

    print("KERNEL_OK")
</pallas_src>

<mosaic_0001>
module attributes {stable_mosaic.version = 11 : i64} {
  func.func @_rmsnorm_kernel(%arg0: i32, %arg1: memref<16x256xbf16, #tpu.memory_space<vmem>>, %arg2: memref<1x256xf32, #tpu.memory_space<vmem>>, %arg3: memref<16x256xbf16, #tpu.memory_space<vmem>>) attributes {dimension_semantics = [#tpu.dimension_semantics<parallel>], iteration_bounds = array<i64: 2>, scalar_prefetch = 0 : i64, scratch_operands = 0 : i64, tpu.core_type = #tpu.core_type<tc>, window_params = [{transform_indices = @transform_0, window_bounds = array<i64: 16, 256>}, {pipeline_mode = #tpu.pipeline_mode<synchronous>, transform_indices = @transform_1, window_bounds = array<i64: 1, 256>}, {transform_indices = @transform_2, window_bounds = array<i64: 16, 256>}]} {
    %c0 = arith.constant 0 : index
    %c0_0 = arith.constant 0 : index
    %0 = vector.load %arg1[%c0, %c0_0] : memref<16x256xbf16, #tpu.memory_space<vmem>>, vector<16x256xbf16>
    %1 = arith.extf %0 : vector<16x256xbf16> to vector<16x256xf32>
    %2 = arith.mulf %1, %1 : vector<16x256xf32>
    %cst = arith.constant dense<0.000000e+00> : vector<16xf32>
    %3 = vector.multi_reduction <add>, %2, %cst [1] : vector<16x256xf32> to vector<16xf32>
    %4 = vector.shape_cast %3 : vector<16xf32> to vector<16x1xf32>
    %cst_1 = arith.constant 2.560000e+02 : f32
    %5 = vector.broadcast %cst_1 : f32 to vector<16x1xf32>
    %6 = arith.divf %4, %5 : vector<16x1xf32>
    %cst_2 = arith.constant 9.99999997E-7 : f32
    %7 = vector.broadcast %cst_2 : f32 to vector<16x1xf32>
    %8 = arith.addf %6, %7 : vector<16x1xf32>
    %9 = math.rsqrt %8 : vector<16x1xf32>
    %10 = arith.extf %0 : vector<16x256xbf16> to vector<16x256xf32>
    %11 = vector.broadcast %9 : vector<16x1xf32> to vector<16x256xf32>
    %12 = arith.mulf %10, %11 : vector<16x256xf32>
    %c0_3 = arith.constant 0 : index
    %c0_4 = arith.constant 0 : index
    %13 = vector.load %arg2[%c0_3, %c0_4] : memref<1x256xf32, #tpu.memory_space<vmem>>, vector<1x256xf32>
    %14 = vector.broadcast %13 : vector<1x256xf32> to vector<16x256xf32>
    %15 = arith.mulf %12, %14 : vector<16x256xf32>
    %16 = arith.truncf %15 : vector<16x256xf32> to vector<16x256xbf16>
    %c0_5 = arith.constant 0 : index
    %c0_6 = arith.constant 0 : index
    %17 = vector.load %arg3[%c0_5, %c0_6] : memref<16x256xbf16, #tpu.memory_space<vmem>>, vector<16x256xbf16>
    tpu.vector_store %arg3[%c0_5, %c0_6], %16 {strides = array<i32>} : memref<16x256xbf16, #tpu.memory_space<vmem>>, vector<16x256xbf16>,
    return
  }
  func.func @transform_0(%arg0: i32) -> (i32, i32) {
    %c0_i32 = arith.constant 0 : i32
    %c0_i32_0 = arith.constant 0 : i32
    return %arg0, %c0_i32 : i32, i32
  }
  func.func @transform_1(%arg0: i32) -> (i32, i32) {
    %c0_i32 = arith.constant 0 : i32
    %c0_i32_0 = arith.constant 0 : i32
    %c0_i32_1 = arith.constant 0 : i32
    return %c0_i32, %c0_i32_0 : i32, i32
  }
  func.func @transform_2(%arg0: i32) -> (i32, i32) {
    %c0_i32 = arith.constant 0 : i32
    %c0_i32_0 = arith.constant 0 : i32
    return %arg0, %c0_i32 : i32, i32
  }
}

</mosaic_0001>

<bundles_post_ra>
// kernel: tpu_custom_call.1
= control target key start
LH: loop header
LB: loop body
LE: loop exit
PB: predicated region body
PF: predicated region fallthrough
CT: control target
= control target key end

     0   :  { %7 = vsyncpa [#allocation3], 0  ;;  %s676_s0 = inlined_call_operand.hbm [shape: bf16[32,256], index: 0, kind: input, shape index: {}]   ;;  %s677_s1 = inlined_call_operand.vmem [shape: f32[1,256], index: 1, kind: input, shape index: {}]   ;;  %s678_s2 = inlined_call_operand.hbm [shape: bf16[32,256], index: 2, kind: output, shape index: {}]  }
   0x1   :  { %9 = vsyncpa [#allocation3 + $0x1], 0 }
   0x2   :  { %10 = vsyncpa [#allocation4], 0 }
   0x3   :  { %12 = vsyncpa [#allocation4 + $0x1], 0  ;;  %s507_s9 = smov 0   ;;  %s509_s10 = smov 0  }
   0x4   :  { %s511_s11 = smov 0   ;;  %s513_s12 = smov 0  }
   0x5 LB: > { %s528_s13 = sadd.s32 4294967295, %s484_s12   ;;  %s310_s14 = sadd.s32 4294967294, %s484_s12   ;;  %s484_s12 = sphi %s513_s12, %s691_s12   ;;  %s480_s11 = sphi %s511_s11, %s690_s11   ;;  %s476_s10 = sphi %s509_s10, %s689_s10   ;;  %s472_s9 = sphi %s507_s9, %s688_s9  }
   0x6   : > { %s532_s15 = sadd.s32 1, %s484_s12   ;;  %s25_s16 = sadd.s32 1, %s480_s11 }
   0x7   : > { %s22_s17 = ssub.s32 %s484_s12, %s532_s15  ;;  %p32_p0 = scmp.ne.s32.totalorder %s480_s11, %s476_s10 }
   0x8   : > { %p23_p1 = scmp.eq.s32.totalorder %s22_s17, 0  ;;  %p33_p2 = scmp.eq.s32.totalorder %s484_s12, 0 }
   0x9   : > { %p38_p3 = scmp.ne.s32.totalorder %s476_s10, %s472_s9  ;;  %p39_p4 = scmp.eq.s32.totalorder %s528_s13, 0 }
   0xa   : > { %s544_s18 = scalar_select %p23_p1, %s480_s11, %s25_s16  }
   0xb   : > { %p546_p5 = por %p33_p2, %p32_p0  ;;  %p550_p6 = por %p39_p4, %p38_p3 }
   0xc   : > { %p83_p7 = scmp.eq.s32.totalorder %s528_s13, 1  ;;  %p89_p8 = scmp.eq.s32.totalorder %s310_s14, 1 }
   0xd   : > { %p346_p10 = scmp.lt.s32.totalorder %s484_s12, 2  ;;  %s112_s23 = sand.u32 1, %s480_s11  }
   0xe   : > { %p557_p11 = por %p83_p7, %p32_p0  ;;  %p561_p12 = por %p89_p8, %p38_p3 }
   0xf   : > { %s329_s24 = sshll.u32 %s484_s12, 8  ;;  %s313_s25 = sshll.u32 %s112_s23, 4 }
  0x10   : > { %s682_s21 = scalar_select %p557_p11, 1, 0 }
  0x11   : > { %s683_s22 = scalar_select %p561_p12, 1, 0 }
  0x12   : > { %s570_s28 = scalar_lea.hbm %s676_s0, %s329_s24  ;;  %s116_s29 = scalar_lea.vmem [#allocation2], %s313_s25 }
  0x13   : > { %s124_s30 = sshll.u32 %s116_s29, 4  ;;  %p574_p13 = pnand %p346_p10, %p546_p5  ;;  %s578_s30 = int_to_ptr.vmem [resolvable:$true] %s124_s30 }
  0x14   : > { %s580_s4 = scalar_lea.sflag [#allocation3], %s112_s23  ;;  %s388_s5 = scalar_lea.hbm %s570_s28, 256 }
  0x15   : > { %p389_p0 = scmp.ne.s32.totalorder %s570_s28, %s388_s5  ;;  %p390_p1 = pneg %p574_p13 }
  0x16   : > { %s393_s8 = scalar_lea.hbm %s676_s0, 512  ;;  %p394_p4 = scmp.lt.u32.totalorder %s570_s28, %s676_s0 }
  0x17   : > { %p391_p2 = pnand %p390_p1, %p389_p0  ;;  %p395_p5 = scmp.lt.u32.totalorder %s393_s8, %s388_s5 }
  0x18   : > { %p397_p8 = scmp.lt.u32.totalorder %s388_s5, %s570_s28 }
  0x19   : > { %p392_p3 = pneg %p391_p2  ;;  %p396_p7 = por %p395_p5, %p394_p4 }
  0x1b   : > { %p398_p10 = por %p397_p8, %p396_p7 }
  0x1d   : > { %p399_p9 = pnand %p398_p10, %p392_p3 }
  0x1f   : > { %402 = shalt.err (!%p399_p9)
}
  0x20   : > { %s403_s17 = scalar_lea.vmem %s578_s30, 256  ;;  %s486_s19 = smov [#allocation2]  }
  0x21   : > { %p404_p0 = scmp.ne.s32.totalorder %s578_s30, %s403_s17  ;;  %s408_s23 = sshll.u32 %s486_s19, 4  ;;  %s409_s23 = int_to_ptr.vmem [resolvable:$false] %s408_s23 }
  0x22   : > { %s410_s24 = scalar_lea.vmem %s409_s23, 512  ;;  %p411_p11 = scmp.lt.s32.totalorder %s578_s30, %s409_s23 }
  0x23   : > { %p406_p2 = pnand %p404_p0, %p390_p1  ;;  %p412_p4 = scmp.lt.s32.totalorder %s410_s24, %s403_s17 }
  0x25   : > { %p407_p12 = pneg %p406_p2  ;;  %p413_p5 = por %p412_p4, %p411_p11 }
  0x27   : > { %p414_p7 = pnand %p413_p5, %p407_p12 }
  0x29   : > { %417 = shalt.err (!%p414_p7)
}
  0x2a   : > { %s487_s25 = smov 128   ;;  %s488_s26 = smov 8  }
  0x2b   : > { %341 = dma.hbm_to_vmem [thread:$0]  (!%p574_p13), %s570_s28, 256, %s578_s30, %s580_s4, %s487_s25, %s487_s25, %s488_s26  }
  0x2c   : > { %p317_p9 = scmp.ge.s32.totalorder %s484_s12, 1  ;;  %p132_p1 = scmp.lt.s32.totalorder %s484_s12, 3 }
  0x2e   : > { %p133_p3 = pnand %p317_p9, %p132_p1 }
  0x2f   : > { %s611_s27 = sand.u32 (!%p133_p3), 1, %s476_s10  }
  0x30   : > { %136 = sbr.rel (%p133_p3) target bundleno = 245 (0xf5), region = 28  ;;  %s318_s29 = sshll.u32 (!%p133_p3), %s611_s27, 4 }
  0x31   : > { %s139_s5 = scalar_lea.sflag (!%p133_p3), [#allocation3], %s611_s27  ;;  %s142_s6 = scalar_lea.vmem (!%p133_p3), [#allocation2], %s318_s29 }
  0x37   : > { %463 = dma.done.wait (%p550_p6), %s139_s5, 256  }
  0x38   : > { %465 = vsyncadd (%p550_p6), %s139_s5, 4294967040  ;;  %v165_v0 = vld [vmem:[%s142_s6] sm:$0xff]  ;;  %v166_v1 = vld [vmem:[%s142_s6 + $0x8] sm:$0xff]  ;;  %v194_v14 = vlaneseq  ;;  %s333_s30 = sshll.u32 %s528_s13, 8  ;;  %s162_s3 = scalar_lea.vmem [#allocation5], %s318_s29 }
  0x39   : > { %v167_v2 = vunpack.c.l.bf16 %v165_v0  ;;  %v168_v3 = vunpack.c.h.bf16 %v165_v0  ;;  %v169_v4 = vunpack.c.l.bf16 %v166_v1  ;;  %v170_v5 = vunpack.c.h.bf16 %v166_v1  ;;  %v192_v22 = vld [vmem:[%s677_s1] sm:$0x3]  ;;  %s237_s4 = sshll.u32 %s162_s3, 4  ;;  %s630_s14 = scalar_lea.hbm %s678_s2, %s333_s30  ;;  %s632_s4 = int_to_ptr.vmem [resolvable:$true] %s237_s4 }
  0x3a   : > { %v195_v18 = vshrl.u32 %v194_v14, 7  ;;  %s223_s16 = scalar_lea.sflag [#allocation4], %s611_s27  ;;  %s418_s13 = scalar_lea.vmem %s632_s4, 256 }
  0x3b   : > { %v171_v6 = vmul.f32 %v167_v2, %v167_v2  ;;  %v172_v7 = vmul.f32 %v168_v3, %v168_v3  ;;  %v173_v8 = vmul.f32 %v169_v4, %v169_v4  ;;  %v174_v9 = vmul.f32 %v170_v5, %v170_v5  ;;  %p419_p6 = scmp.ne.s32.totalorder %s632_s4, %s418_s13  ;;  %p685_p11 = scmp.ne.s32.totalorder %s682_s21, 0 }
  0x3c   : > { %v196_v20 = vsub.s32 0, %v195_v18  ;;  %v200_v21 = vsub.s32 1, %v195_v18  ;;  %s489_s17 = smov [#allocation5]  }
  0x3d   : > { %v175_v10 = vadd.f32 %v172_v7, %v171_v6  ;;  %v178_v11 = vadd.f32 %v174_v9, %v173_v8  ;;  %p420_p12 = pnand %p419_p6, %p685_p11  ;;  %s422_s19 = sshll.u32 %s489_s17, 4  ;;  %s423_s19 = int_to_ptr.vmem [resolvable:$false] %s422_s19 }
  0x3e   : > { %v197_v23 = vrot.slane %v192_v22, %v196_v20  ;;  %v201_v24 = vrot.slane %v192_v22, %v200_v21  ;;  %s424_s23 = scalar_lea.vmem %s423_s19, 512  ;;  %p425_p8 = scmp.lt.s32.totalorder %s632_s4, %s423_s19 }
  0x3f   : > { %176 = vadd.xlane.f32.xlu0 %v175_v10  ;;  %p421_p13 = pneg %p420_p12  ;;  %p426_p10 = scmp.lt.s32.totalorder %s424_s23, %s418_s13 }
  0x41   : > { %p427_p0 = por %p426_p10, %p425_p8 }
  0x43   : > { %179 = vadd.xlane.f32.xlu0 %v178_v11  ;;  %p428_p2 = pnand %p427_p0, %p421_p13 }
  0xcc   : > { %v177_v12 = vpop.xlane.xlu0 %176 }
  0xcd   : > { %v182_v13 = vmul.f32 0.00390625, %v177_v12 }
  0xcf   : > { %v184_v15 = vadd.f32 1e-06, %v182_v13 }
  0xd0   : > { %v180_v16 = vpop.xlane.xlu0 %179 }
  0xd1   : > { %384 = vrsqrt.f32 %v184_v15  ;;  %v183_v17 = vmul.f32 0.00390625, %v180_v16 }
  0xd3   : > { %v185_v19 = vadd.f32 1e-06, %v183_v17 }
  0xd5   : > { %386 = vrsqrt.f32 %v185_v19 }
  0xdb   : > { %v385_v25 = vpop.eup %384 }
  0xdc   : > { %v188_v26 = vmul.f32 %v385_v25, %v167_v2  ;;  %v189_v27 = vmul.f32 %v385_v25, %v168_v3 }
  0xde   : > { %v204_v28 = vmul.f32 %v197_v23, %v188_v26  ;;  %v205_v29 = vmul.f32 %v201_v24, %v189_v27 }
  0xdf   : > { %v387_v30 = vpop.eup %386 }
  0xe0   : > { %v330_v31 = vpack.c.bf16 %v205_v29, %v204_v28  ;;  %v190_v32 = vmul.f32 %v387_v30, %v169_v4  ;;  %v191_v33 = vmul.f32 %v387_v30, %v170_v5 }
  0xe2   : > { %v206_v34 = vmul.f32 %v197_v23, %v190_v32  ;;  %v207_v35 = vmul.f32 %v201_v24, %v191_v33  ;;  %220 = vst [vmem:[%s162_s3] sm:$0xff] %v330_v31 }
  0xe4   : > { %v331_v36 = vpack.c.bf16 %v207_v35, %v206_v34 }
  0xe6   : > { %221 = vst [vmem:[%s162_s3 + $0x8] sm:$0xff] %v331_v36 }
  0xe7   : > { %431 = shalt.err (!%p428_p2)
}
  0xe8   : > { %s432_s24 = scalar_lea.hbm %s630_s14, 256  ;;  %s436_s29 = scalar_lea.hbm %s678_s2, 512 }
  0xe9   : > { %p433_p4 = scmp.ne.s32.totalorder %s630_s14, %s432_s24  ;;  %p437_p9 = scmp.lt.u32.totalorder %s630_s14, %s678_s2 }
  0xea   : > { %p438_p1 = scmp.lt.u32.totalorder %s436_s29, %s432_s24  ;;  %p440_p6 = scmp.lt.u32.totalorder %s432_s24, %s630_s14 }
  0xeb   : > { %p434_p5 = pnand %p433_p4, %p685_p11 }
  0xec   : > { %p439_p3 = por %p438_p1, %p437_p9 }
  0xed   : > { %p435_p7 = pneg %p434_p5 }
  0xee   : > { %p441_p12 = por %p440_p6, %p439_p3 }
  0xf0   : > { %p442_p13 = pnand %p441_p12, %p435_p7 }
  0xf2   : > { %445 = shalt.err (!%p442_p13)
}
  0xf3   : > { %s490_s20 = smov 128   ;;  %s491_s28 = smov 8  }
  0xf4   : > { %336 = dma.vmem_to_hbm [thread:$0]  (%p685_p11), %s632_s4, 256, %s630_s14, %s223_s16, %s490_s20, %s490_s20, %s491_s28  }
  0xf5 PF: > { %s252_s30 = sand.u32 1, %s472_s9   ;;  %p686_p8 = scmp.ne.s32.totalorder %s683_s22, 0 }
  0xf6   : > { %p687_p10 = scmp.ge.s32.totalorder %s484_s12, 2  ;;  %s253_s3 = scalar_lea.sflag [#allocation4], %s252_s30 }
  0xf8   : > { %p343_p0 = pnand %p687_p10, %p686_p8 }
  0xfa   : > { %467 = dma.done.wait (!%p343_p0), %s253_s3, 256  }
  0xfb   : > { %469 = vsyncadd (!%p343_p0), %s253_s3, 4294967040  ;;  %p15_p2 = scmp.ge.s32.totalorder %s532_s15, 4   ;;  %s688_s9 = smov %s476_s10 }
  0xfc   : > { %s689_s10 = smov %s480_s11  ;;  %s690_s11 = smov %s544_s18 }
  0xfd   : > { %s691_s12 = smov %s532_s15  ;;  %17 = sbr.rel (!%p15_p2) target bundleno = 5 (0x5), region = 73 }
 0x104   :  { %258 = vsyncpa [#allocation3], 1 }
 0x105   :  { %260 = vsyncpa [#allocation3 + $0x1], 1 }
 0x106   :  { %261 = vsyncpa [#allocation4], 1 }
 0x107   :  { %263 = vsyncpa [#allocation4 + $0x1], 1 }

</bundles_post_ra>
